<compile_context>
chip_gen: v7x
topology: tpu7x:2x2x1
jax: 0.10.0
libtpu: 0.0.40
codegen_flags: <defaults>
</compile_context>

<pallas_src>
import jax
import jax.numpy as jnp
from jax.experimental import pallas as pl
from jax.experimental.pallas import tpu as pltpu


def depth_head_kernel(x_ref, w_ref, b_ref, o_ref):
    # x_ref: (1, C, THW)  input tile for one batch element / one spatial tile (VMEM)
    # w_ref: (1, C)       conv weight, flattened 1x1 kernel (VMEM, grid-invariant)
    # b_ref: (1,)         conv bias (SMEM scalar)
    # o_ref: (1, 1, THW)  output tile (VMEM)
    x = x_ref[0]                                              # (C, THW)
    w = w_ref[...]                                            # (1, C)
    acc = jnp.dot(
        w, x,
        preferred_element_type=jnp.float32,
        precision=jax.lax.Precision.HIGHEST,                  # full f32 reduction
    )                                                         # (1, THW)
    o_ref[0] = (acc + b_ref[0]).astype(o_ref.dtype)


def depth_head(x_nchw, weight, bias, *, target_tile_bytes=12 * 1024 * 1024):
    """1x1 conv: x_nchw (N, C, H, W), weight (1, C, 1, 1), bias (1,) -> (N, 1, H, W)."""
    N, C, H, W = x_nchw.shape
    HW = H * W
    x_flat = x_nchw.reshape(N, C, HW)
    w2d = weight.reshape(1, C)                 # (out=1, in=C)
    b1d = bias.reshape(1)                      # scalar bias -> SMEM

    itemsize = jnp.dtype(x_nchw.dtype).itemsize

    # --- Spatial tile size -------------------------------------------------------
    # ~target_tile_bytes per x tile, multiple of 128 lanes.
    thw = max(128, (target_tile_bytes // (C * itemsize)) // 128 * 128)
    if thw >= HW:
        thw = HW                                # full-extent block (always legal)
    num_hw_tiles = pl.cdiv(HW, thw)

    # Keep at least ~4 grid steps so the double-buffered pipeline has overlap.
    min_steps = 4
    if N * num_hw_tiles < min_steps and HW > 128:
        needed_tiles = pl.cdiv(min_steps, N)
        thw = max(128, pl.cdiv(pl.cdiv(HW, needed_tiles), 128) * 128)
        if thw >= HW:
            thw = HW
        num_hw_tiles = pl.cdiv(HW, thw)
    # NOTE: if THW does not divide HW, the trailing tile is a Pallas boundary block:
    # OOB input lanes only feed OOB output lanes (the contraction axis C is fully
    # in-bounds), and those writes are discarded, so in-bounds results stay correct.

    # --- Explicit VMEM budget ----------------------------------------------------
    # Double-buffered x tile + 8-sublane-padded output tile + padded weight tile.
    x_tile_bytes = C * thw * itemsize
    out_tile_bytes = 8 * thw * itemsize                       # (1,1,thw) pads to 8 sublanes
    w_tile_bytes = 8 * (pl.cdiv(C, 128) * 128) * itemsize
    vmem_bytes = 2 * (x_tile_bytes + out_tile_bytes + w_tile_bytes) + (2 << 20)
    vmem_limit = int(min(max(vmem_bytes, 16 << 20), 48 << 20))  # stay well under v7x's 64 MiB

    # --- Cost estimate (HBM-heavy custom call) -----------------------------------
    cost = pl.CostEstimate(
        flops=2 * N * C * HW,
        bytes_accessed=(N * C * HW + N * HW) * itemsize
        + C * jnp.dtype(weight.dtype).itemsize
        + jnp.dtype(bias.dtype).itemsize,
        transcendentals=0,
    )

    out = pl.pallas_call(
        depth_head_kernel,
        out_shape=jax.ShapeDtypeStruct((N, 1, HW), x_nchw.dtype),
        grid_spec=pltpu.PrefetchScalarGridSpec(
            num_scalar_prefetch=0,
            grid=(N, num_hw_tiles),
            in_specs=[
                pl.BlockSpec((1, C, thw), lambda n, t: (n, 0, t)),
                pl.BlockSpec((1, C), lambda n, t: (0, 0)),
                pl.BlockSpec(memory_space=pltpu.MemorySpace.SMEM),
            ],
            out_specs=pl.BlockSpec((1, 1, thw), lambda n, t: (n, 0, t)),
        ),
        compiler_params=pltpu.CompilerParams(
            dimension_semantics=("parallel", "parallel"),
            vmem_limit_bytes=vmem_limit,
        ),
        cost_estimate=cost,
    )(x_flat, w2d, b1d)

    return out.reshape(N, 1, H, W)


if __name__ == "__main__":
    # Small, forward-consistent shapes: batch=2, in_channels=32, spatial 16x16.
    N, C, H, W = 2, 32, 16, 16

    key = jax.random.PRNGKey(0)
    kx, kw, kb = jax.random.split(key, 3)

    x = jax.random.normal(kx, (N, C, H, W), dtype=jnp.float32)
    # Deterministic parameter init (Conv2d(in_channels=C, out=1, kernel_size=1)):
    weight = jax.random.normal(kw, (1, C, 1, 1), dtype=jnp.float32) * 0.02
    bias = jax.random.normal(kb, (1,), dtype=jnp.float32) * 0.02

    out = depth_head(x, weight, bias)
    out = jax.block_until_ready(out)

    # Reference: plain JAX 1x1 conv (einsum over channel axis).
    ref = jnp.einsum("nchw,oc->nohw", x, weight.reshape(1, C)) + bias.reshape(1, 1, 1, 1)
    assert out.shape == (N, 1, H, W)
    assert jnp.allclose(out, ref, atol=1e-5, rtol=1e-5), "mismatch vs reference"

    print("KERNEL_OK")
</pallas_src>

<mosaic_0001>
module attributes {stable_mosaic.version = 11 : i64} {
  func.func @depth_head_kernel(%arg0: i32, %arg1: i32, %arg2: memref<1x32x128xf32, #tpu.memory_space<vmem>>, %arg3: memref<1x32xf32, #tpu.memory_space<vmem>>, %arg4: memref<1xf32, #tpu.memory_space<smem>>, %arg5: memref<1x1x128xf32, #tpu.memory_space<vmem>>) attributes {dimension_semantics = [#tpu.dimension_semantics<parallel>, #tpu.dimension_semantics<parallel>], iteration_bounds = array<i64: 2, 2>, scalar_prefetch = 0 : i64, scratch_operands = 0 : i64, tpu.core_type = #tpu.core_type<tc>, window_params = [{transform_indices = @transform_0, window_bounds = array<i64: 1, 32, 128>}, {pipeline_mode = #tpu.pipeline_mode<synchronous>, transform_indices = @transform_1, window_bounds = array<i64: 1, 32>}, {transform_indices = @transform_2, window_bounds = array<i64: 1>}, {transform_indices = @transform_3, window_bounds = array<i64: 1, 1, 128>}]} {
    %c0 = arith.constant 0 : index
    %c0_0 = arith.constant 0 : index
    %c0_1 = arith.constant 0 : index
    %0 = vector.load %arg2[%c0, %c0_0, %c0_1] : memref<1x32x128xf32, #tpu.memory_space<vmem>>, vector<1x32x128xf32>
    %1 = vector.shape_cast %0 : vector<1x32x128xf32> to vector<32x128xf32>
    %c0_2 = arith.constant 0 : index
    %c0_3 = arith.constant 0 : index
    %2 = vector.load %arg3[%c0_2, %c0_3] : memref<1x32xf32, #tpu.memory_space<vmem>>, vector<1x32xf32>
    %cst = arith.constant dense<0.000000e+00> : vector<1x128xf32>
    %3 = tpu.matmul %2, %1, %cst {dimension_numbers = #tpu.dot_dimension_numbers<[1], [0], [0], [1], [0, 0, 1, 1], [], []>, precision = #tpu.contract_precision<fp32>} : vector<1x32xf32>, vector<32x128xf32>, vector<1x128xf32> -> vector<1x128xf32>
    %c0_4 = arith.constant 0 : index
    %4 = memref.load %arg4[%c0_4] : memref<1xf32, #tpu.memory_space<smem>>
    %5 = vector.broadcast %4 : f32 to vector<1x128xf32>
    %6 = arith.addf %3, %5 : vector<1x128xf32>
    %c0_5 = arith.constant 0 : index
    %c0_6 = arith.constant 0 : index
    %c0_7 = arith.constant 0 : index
    %7 = vector.load %arg5[%c0_5, %c0_6, %c0_7] : memref<1x1x128xf32, #tpu.memory_space<vmem>>, vector<1x1x128xf32>
    %8 = vector.shape_cast %7 : vector<1x1x128xf32> to vector<1x128xf32>
    %9 = vector.shape_cast %6 : vector<1x128xf32> to vector<1x1x128xf32>
    tpu.vector_store %arg5[%c0_5, %c0_6, %c0_7], %9 {strides = array<i32>} : memref<1x1x128xf32, #tpu.memory_space<vmem>>, vector<1x1x128xf32>,
    return
  }
  func.func @transform_0(%arg0: i32, %arg1: i32) -> (i32, i32, i32) {
    %c0_i32 = arith.constant 0 : i32
    %c0_i32_0 = arith.constant 0 : i32
    return %arg0, %c0_i32, %arg1 : i32, i32, i32
  }
  func.func @transform_1(%arg0: i32, %arg1: i32) -> (i32, i32) {
    %c0_i32 = arith.constant 0 : i32
    %c0_i32_0 = arith.constant 0 : i32
    %c0_i32_1 = arith.constant 0 : i32
    return %c0_i32, %c0_i32_0 : i32, i32
  }
  func.func @transform_2(%arg0: i32, %arg1: i32) -> i32 {
    %c0_i32 = arith.constant 0 : i32
    %c0_i32_0 = arith.constant 0 : i32
    return %c0_i32 : i32
  }
  func.func @transform_3(%arg0: i32, %arg1: i32) -> (i32, i32, i32) {
    %c0_i32 = arith.constant 0 : i32
    %c0_i32_0 = arith.constant 0 : i32
    return %arg0, %c0_i32, %arg1 : i32, i32, i32
  }
}

</mosaic_0001>

<bundles_post_ra>
// kernel: tpu_custom_call.1
= control target key start
LH: loop header
LB: loop body
LE: loop exit
PB: predicated region body
PF: predicated region fallthrough
CT: control target
= control target key end

     0   :  { %s1420_s0 = inlined_call_operand.hbm [shape: f32[2,32,256], index: 0, kind: input, shape index: {}]   ;;  %s1421_s1 = inlined_call_operand.vmem [shape: f32[1,32], index: 1, kind: input, shape index: {}]   ;;  %s1422_s2 = inlined_call_operand.<no memory space> [shape: f32[1], index: 2, kind: input, shape index: {}]   ;;  %s1423_s3 = inlined_call_operand.hbm [shape: f32[2,1,256], index: 3, kind: output, shape index: {}]  }
   0x1   :  { %8 = sst [smem:[#allocation2]] %s1422_s2 }
   0x2   :  { %9 = vsyncpa [#allocation4], 0 }
   0x3   :  { %11 = vsyncpa [#allocation4 + $0x1], 0 }
   0x4   :  { %12 = vsyncpa [#allocation5], 0 }
   0x5   :  { %14 = vsyncpa [#allocation5 + $0x1], 0  ;;  %s1199_s14 = smov 0   ;;  %s1201_s15 = smov 0  }
   0x6   :  { %s1203_s16 = smov 0   ;;  %s1205_s17 = smov 0  }
   0x7   :  { %s1207_s18 = smov 0   ;;  %s1209_s19 = smov 0  }
   0x8   :  { %s1211_s20 = smov 0   ;;  %s1213_s21 = smov 0  }
   0x9 LB: > { %s799_s2 = sadd.s32 4294967295, %s1166_s21   ;;  %s800_s22 = sadd.s32 4294967294, %s1166_s21   ;;  %s1166_s21 = sphi %s1213_s21, %s20_s21   ;;  %s1162_s20 = sphi %s1211_s20, %s1438_s20   ;;  %s1158_s19 = sphi %s1209_s19, %s1437_s19   ;;  %s1154_s18 = sphi %s1207_s18, %s1436_s18   ;;  %s1150_s17 = sphi %s1205_s17, %s1435_s17   ;;  %s1146_s16 = sphi %s1203_s16, %s1434_s16   ;;  %s1142_s15 = sphi %s1201_s15, %s1433_s15   ;;  %s1138_s14 = sphi %s1199_s14, %s1432_s14  }
   0xa   : > { %s29_s23 = sadd.s32 1, %s1158_s19  ;;  %s32_s24 = sadd.s32 1, %s1162_s20 }
   0xb   : > { %p30_p0 = scmp.ge.s32.totalorder %s29_s23, 2  ;;  %s41_s25 = sadd.s32 1, %s1146_s16 }
   0xc   : > { %p48_p1 = scmp.ne.s32.totalorder %s1146_s16, %s1142_s15  ;;  %p49_p2 = scmp.eq.s32.totalorder %s1166_s21, 0 }
   0xd   : > { %s1440_s23 = smov (%p30_p0, %s29_s23), 0  ;;  %s1442_s24 = smov (!%p30_p0, %s32_s24), %s1162_s20 }
   0xe   : > { %s37_s26 = ssub.s32 %s1158_s19, %s1440_s23  ;;  %p1252_p3 = por %p49_p2, %p48_p1 }
   0xf   : > { %p34_p4 = scmp.ge.s32.totalorder %s1442_s24, 2  ;;  %p54_p5 = scmp.ne.s32.totalorder %s1142_s15, %s1138_s14 }
  0x10   : > { %p55_p6 = scmp.eq.s32.totalorder %s799_s2, 0  ;;  %p122_p7 = scmp.eq.s32.totalorder %s799_s2, 3 }
  0x11   : > { %s1444_s24 = smov (%p34_p4, %s1442_s24), 0  ;;  %p128_p10 = scmp.eq.s32.totalorder %s800_s22, 3 }
  0x12   : > { %p1260_p8 = por %p55_p6, %p54_p5  ;;  %p1264_p9 = por %p122_p7, %p48_p1 }
  0x13   : > { %s36_s30 = ssub.s32 %s1162_s20, %s1444_s24  ;;  %p1270_p12 = por %p128_p10, %p54_p5 }
  0x14   : > { %s1427_s29 = scalar_select %p1264_p9, 1, 0 }
  0x15   : > { %s38_s4 = sor.u32 %s37_s26, %s36_s30  ;;  %p966_p13 = scmp.lt.s32.totalorder %s1166_s21, 4 }
  0x16   : > { %p39_p11 = scmp.eq.s32.totalorder %s38_s4, 0  ;;  %s154_s6 = sand.u32 1, %s1146_s16  }
  0x17   : > { %s1428_s5 = scalar_select %p1270_p12, 1, 0 }
  0x18   : > { %s1277_s7 = scalar_select %p39_p11, %s1146_s16, %s41_s25  }
  0x19   : > { %s803_s8 = sshll.u32 %s154_s6, 5  ;;  %s804_s9 = sshll.u32 %s1162_s20, 3 }
  0x1a   : > { %s163_s10 = sadd.s32 %s1158_s19, %s804_s9  ;;  %s158_s11 = scalar_lea.vmem [#allocation3], %s803_s8 }
  0x1b   : > { %s166_s12 = sshll.u32 %s158_s11, 4  ;;  %s805_s13 = sshll.u32 %s163_s10, 7  ;;  %s1281_s12 = int_to_ptr.vmem [resolvable:$true] %s166_s12 }
  0x1c   : > { %s1286_s26 = scalar_lea.hbm %s1420_s0, %s805_s13  ;;  %p1290_p0 = pnand %p966_p13, %p1252_p3 }
  0x1d   : > { %s1294_s30 = scalar_lea.sflag [#allocation4], %s154_s6  ;;  %s1038_s4 = scalar_lea.hbm %s1286_s26, 512 }
  0x1e   : > { %p1039_p1 = scmp.ne.s32.totalorder %s1286_s26, %s1038_s4  ;;  %p1040_p2 = pneg %p1290_p0 }
  0x1f   : > { %s1043_s9 = scalar_lea.hbm %s1420_s0, 2048  ;;  %p1044_p3 = scmp.lt.u32.totalorder %s1286_s26, %s1420_s0 }
  0x20   : > { %p1041_p4 = pnand %p1040_p2, %p1039_p1  ;;  %p1045_p6 = scmp.lt.u32.totalorder %s1043_s9, %s1038_s4 }
  0x21   : > { %p1047_p10 = scmp.lt.u32.totalorder %s1038_s4, %s1286_s26 }
  0x22   : > { %p1042_p5 = pneg %p1041_p4  ;;  %p1046_p7 = por %p1045_p6, %p1044_p3 }
  0x24   : > { %p1048_p11 = por %p1047_p10, %p1046_p7 }
  0x26   : > { %p1049_p13 = pnand %p1048_p11, %p1042_p5 }
  0x28   : > { %1052 = shalt.err (!%p1049_p13)
}
  0x29   : > { %s1053_s6 = scalar_lea.vmem %s1281_s12, 512  ;;  %s1168_s13 = smov [#allocation3]  }
  0x2a   : > { %p1054_p1 = scmp.ne.s32.totalorder %s1281_s12, %s1053_s6  ;;  %s1058_s2 = sshll.u32 %s1168_s13, 4  ;;  %s1059_s2 = int_to_ptr.vmem [resolvable:$false] %s1058_s2 }
  0x2b   : > { %s1060_s22 = scalar_lea.vmem %s1059_s2, 1024  ;;  %p1061_p9 = scmp.lt.s32.totalorder %s1281_s12, %s1059_s2 }
  0x2c   : > { %p1056_p4 = pnand %p1054_p1, %p1040_p2  ;;  %p1062_p3 = scmp.lt.s32.totalorder %s1060_s22, %s1053_s6 }
  0x2e   : > { %p1057_p12 = pneg %p1056_p4  ;;  %p1063_p6 = por %p1062_p3, %p1061_p9 }
  0x30   : > { %p1064_p7 = pnand %p1063_p6, %p1057_p12 }
  0x32   : > { %1067 = shalt.err (!%p1064_p7)
}
  0x33   : > { %s1169_s4 = smov 256   ;;  %s1170_s27 = smov 128  }
  0x34   : > { %s1171_s8 = smov 8   ;;  %p806_p2 = scmp.ge.s32.totalorder %s1166_s21, 1 }
  0x35   : > { %961 = dma.hbm_to_vmem [thread:$0]  (!%p1290_p0), %s1286_s26, 512, %s1281_s12, %s1294_s30, %s1169_s4, %s1170_s27, %s1171_s8  }
  0x36   : > { %p174_p5 = scmp.lt.s32.totalorder %s1166_s21, 5 }
  0x38   : > { %p175_p10 = pnand %p806_p2, %p174_p5 }
  0x39   : > { %s1325_s9 = sand.u32 (!%p175_p10), 1, %s1142_s15  }
  0x3a   : > { %178 = sbr.rel (%p175_p10) target bundleno = 327 (0x147), region = 32  ;;  %s807_s10 = sshll.u32 (!%p175_p10), %s1325_s9, 5 }
  0x3b   : > { %s181_s11 = scalar_lea.sflag (!%p175_p10), [#allocation4], %s1325_s9  ;;  %s184_s6 = scalar_lea.vmem (!%p175_p10), [#allocation3], %s807_s10 }
  0x41   : > { %1129 = dma.done.wait (%p1260_p8), %s181_s11, 512  }
  0x42   : > { %1131 = vsyncadd (%p1260_p8), %s181_s11, 4294966784  ;;  %v1172_v0 = vmov 0.0|0.0   ;;  %vm1173_vm0 = vmmov 0   ;;  %v1174_v1 = vmov 0.0   ;;  %vm213_vm1 = vcmask 261120   ;;  %v206_v2 = vld [vmem:[%s184_s6] sm:$0xff] }
  0x43   : > { %908 = vmatprep.subr.bf16.mxu1 %v1172_v0  ;;  %926 = vmatprep.subr.bf16.mxu0 %v1172_v0  ;;  %v207_v3 = vld [vmem:[%s184_s6 + $0x8] sm:$0xff]  ;;  %v208_v4 = vld [vmem:[%s184_s6 + $0x10] sm:$0xff]  ;;  %v218_v5 = vand.u32 4294901760, %v206_v2  ;;  %v209_v7 = vld [vmem:[%s184_s6 + $0x18] sm:$0xff]  ;;  %s211_s26 = sld [smem:[#allocation2]]  ;;  %s808_s25 = sshll.u32 %s1154_s18, 1 }
  0x44   : > { %850 = vmatprep.mubr.msk.f32.mxu1 %vm1173_vm0, %v1174_v1  ;;  %883 = vmatprep.mubr.msk.f32.mxu0 %vm1173_vm0, %v1174_v1  ;;  %v221_v6 = vand.u32 4294901760, %v207_v3  ;;  %v224_v8 = vand.u32 4294901760, %v208_v4  ;;  %v210_v9 = vld [vmem:[%s1421_s1] sm:$0x1]  ;;  %v227_v10 = vand.u32 4294901760, %v209_v7  ;;  %s714_s30 = sadd.s32 %s1150_s17, %s808_s25  ;;  %s205_s2 = scalar_lea.vmem [#allocation6], %s1325_s9 }
  0x45   : > { %v215_v11 = vsel %vm213_vm1, %v210_v9, 0  ;;  %v298_v13 = vsub.f32 %v206_v2, %v218_v5  ;;  %s809_s13 = sshll.u32 %s714_s30, 4  ;;  %s718_s22 = sshll.u32 %s205_s2, 4  ;;  %s1368_s22 = int_to_ptr.vmem [resolvable:$true] %s718_s22 }
  0x46   : > { %v909_v12 = vpack.c.bf16 %v221_v6, %v218_v5  ;;  %v305_v14 = vsub.f32 %v207_v3, %v221_v6  ;;  %v312_v15 = vsub.f32 %v208_v4, %v224_v8  ;;  %v319_v16 = vsub.f32 %v209_v7, %v227_v10  ;;  %s1366_s8 = scalar_lea.hbm %s1423_s3, %s809_s13  ;;  %s704_s17 = scalar_lea.sflag [#allocation5], %s1325_s9 }
  0x47   : > { %v286_v17 = vand.u32 4294901760, %v215_v11  ;;  %v912_v18 = vpack.c.bf16 %v227_v10, %v224_v8  ;;  %v299_v19 = vand.u32 4294901760, %v298_v13  ;;  %s1068_s18 = scalar_lea.vmem %s1368_s22, 16  ;;  %p1430_p9 = scmp.ne.s32.totalorder %s1427_s29, 0 }
  0x48   : > { %910 = vmatpush3.bf16.msra.mxu1 %v909_v12  ;;  %928 = vmatpush3.bf16.msra.mxu0 %v909_v12  ;;  %v306_v20 = vand.u32 4294901760, %v305_v14  ;;  %v313_v21 = vand.u32 4294901760, %v312_v15  ;;  %v320_v23 = vand.u32 4294901760, %v319_v16  ;;  %v921_v39 = vpack.c.bf16 %v305_v14, %v298_v13  ;;  %p1069_p8 = scmp.ne.s32.totalorder %s1368_s22, %s1068_s18  ;;  %s1175_s10 = smov [#allocation6]  }
  0x49   : > { %911 = vmatprep.subr.bf16.mxu1 %v1172_v0  ;;  %929 = vmatprep.subr.bf16.mxu0 %v1172_v0  ;;  %v287_v22 = vsub.f32 %v215_v11, %v286_v17  ;;  %v300_v24 = vsub.f32 %v298_v13, %v299_v19  ;;  %v924_v40 = vpack.c.bf16 %v319_v16, %v312_v15  ;;  %v212_v41 = vstv %s211_s26  ;;  %s1072_s11 = sshll.u32 %s1175_s10, 4  ;;  %s1073_s11 = int_to_ptr.vmem [resolvable:$false] %s1072_s11 }
  0x4a   : > { %v307_v25 = vsub.f32 %v305_v14, %v306_v20  ;;  %v314_v26 = vsub.f32 %v312_v15, %v313_v21  ;;  %v321_v28 = vsub.f32 %v319_v16, %v320_v23  ;;  %v933_v31 = vpack.c.bf16 %v306_v20, %v299_v19  ;;  %p1070_p12 = pnand %p1069_p8, %p1430_p9  ;;  %s1074_s6 = scalar_lea.vmem %s1073_s11, 32 }
  0x4b   : > { %v288_v27 = vand.u32 4294901760, %v287_v22  ;;  %v301_v29 = vand.u32 4294901760, %v300_v24  ;;  %v936_v37 = vpack.c.bf16 %v320_v23, %v313_v21  ;;  %p1075_p11 = scmp.lt.s32.totalorder %s1368_s22, %s1073_s11  ;;  %p1076_p13 = scmp.lt.s32.totalorder %s1074_s6, %s1068_s18 }
  0x4c   : > { %913 = vmatpush3.bf16.msra.mxu1 %v912_v18  ;;  %931 = vmatpush3.bf16.msra.mxu0 %v912_v18  ;;  %v308_v30 = vand.u32 4294901760, %v307_v25  ;;  %v315_v34 = vand.u32 4294901760, %v314_v26  ;;  %v322_v35 = vand.u32 4294901760, %v321_v28  ;;  %p1071_p0 = pneg %p1070_p12 }
  0x4d   : > { %v289_v32 = vsub.f32 %v287_v22, %v288_v27  ;;  %914 = vmatprep.subr.bf16.mxu1 %v1172_v0  ;;  %932 = vmatprep.subr.bf16.mxu0 %v1172_v0  ;;  %p1077_p1 = por %p1076_p13, %p1075_p11 }
  0x4e   : > { %v915_v33 = vpack.c.bf16 %v308_v30, %v301_v29  ;;  %v918_v38 = vpack.c.bf16 %v322_v35, %v315_v34 }
  0x4f   : > { %v290_v36 = vand.u32 4294901760, %v289_v32  ;;  %884 = vmatmul.mubr.f32.vlgmr.msra.gmra.mrb[0].mxu0 %v288_v27  ;;  %p1078_p4 = pnand %p1077_p1, %p1071_p0 }
  0x50   : > { %934 = vmatpush3.bf16.msra.mxu0 %v933_v31  ;;  %894 = vmatprep.mubr.msk.f32.mxu0 %vm1173_vm0, %v1174_v1 }
  0x51   : > { %851 = vmatmul.mubr.f32.vlgmr.msra.gmra.mrb[0].mxu1 %v290_v36  ;;  %935 = vmatprep.subr.bf16.mxu0 %v1172_v0 }
  0x52   : > { %916 = vmatpush3.bf16.msra.mxu1 %v915_v33  ;;  %861 = vmatprep.mubr.msk.f32.mxu1 %vm1173_vm0, %v1174_v1 }
  0x53   : > { %917 = vmatprep.subr.bf16.mxu1 %v1172_v0 }
  0x54   : > { %937 = vmatpush3.bf16.msra.mxu0 %v936_v37 }
  0x55   : > { %938 = vmatprep.subr.bf16.mxu0 %v1172_v0 }
  0x56   : > { %919 = vmatpush3.bf16.msra.mxu1 %v918_v38 }
  0x57   : > { %920 = vmatprep.subr.bf16.mxu1 %v1172_v0  ;;  %895 = vmatmul.mubr.f32.vlgmr.msra.gmra.mrb[0].mxu0 %v286_v17 }
  0x58   : > { %940 = vmatpush3.bf16.msra.mxu0 %v909_v12  ;;  %905 = vmatprep.mubr.msk.f32.mxu0 %vm1173_vm0, %v1174_v1 }
  0x59   : > { %862 = vmatmul.mubr.f32.vlgmr.msra.gmra.mrb[0].mxu1 %v286_v17  ;;  %941 = vmatprep.subr.bf16.mxu0 %v1172_v0 }
  0x5a   : > { %922 = vmatpush3.bf16.msra.mxu1 %v921_v39  ;;  %872 = vmatprep.mubr.msk.f32.mxu1 %vm1173_vm0, %v1174_v1 }
  0x5b   : > { %923 = vmatprep.subr.bf16.mxu1 %v1172_v0 }
  0x5c   : > { %943 = vmatpush3.bf16.msra.mxu0 %v912_v18 }
  0x5e   : > { %925 = vmatpush3.bf16.msra.mxu1 %v924_v40 }
  0x5f   : > { %906 = vmatmul.mubr.f32.vlgmr.msra.gmra.mrb[0].mxu0 %v286_v17 }
  0x61   : > { %873 = vmatmul.mubr.f32.vlgmr.msra.gmra.mrb[0].mxu1 %v287_v22 }
 0x132   : > { %v698_v42 = vpop.f32.mrb[0].mxu0 }
 0x133   : > { %v907_v43 = vpop.f32.mrb[1].mxu0 }
 0x134   : > { %v463_v44 = vpop.f32.mrb[0].mxu1 }
 0x135   : > { %v944_v45 = vadd.f32 %v463_v44, %v212_v41  ;;  %v874_v46 = vpop.f32.mrb[1].mxu1 }
 0x137   : > { %v945_v47 = vadd.f32 %v944_v45, %v698_v42 }
 0x139   : > { %702 = vst [vmem:[%s205_s2] sm:$0x1] %v945_v47 }
 0x13a   : > { %1081 = shalt.err (!%p1078_p4)
}
 0x13b   : > { %s1082_s9 = scalar_lea.hbm %s1366_s8, 16  ;;  %s1086_s26 = scalar_lea.hbm %s1423_s3, 64 }
 0x13c   : > { %p1083_p3 = scmp.ne.s32.totalorder %s1366_s8, %s1082_s9  ;;  %p1087_p2 = scmp.lt.u32.totalorder %s1366_s8, %s1423_s3 }
 0x13d   : > { %p1088_p5 = scmp.lt.u32.totalorder %s1086_s26, %s1082_s9  ;;  %p1090_p8 = scmp.lt.u32.totalorder %s1082_s9, %s1366_s8 }
 0x13e   : > { %p1084_p6 = pnand %p1083_p3, %p1430_p9 }
 0x13f   : > { %p1089_p10 = por %p1088_p5, %p1087_p2 }
 0x140   : > { %p1085_p7 = pneg %p1084_p6 }
 0x141   : > { %p1091_p12 = por %p1090_p8, %p1089_p10 }
 0x143   : > { %p1092_p0 = pnand %p1091_p12, %p1085_p7 }
 0x145   : > { %1095 = shalt.err (!%p1092_p0)
}
 0x146   : > { %956 = dma.vmem_to_hbm [thread:$0]  (%p1430_p9), %s1368_s22, 16, %s1366_s8, %s704_s17  }
 0x147 PF: > { %p967_p11 = scmp.ge.s32.totalorder %s1166_s21, 2  ;;  %s730_s13 = sand.u32 1, %s1138_s14  }
 0x148   : > { %p1431_p13 = scmp.ne.s32.totalorder %s1428_s5, 0  ;;  %s731_s2 = scalar_lea.sflag [#allocation5], %s730_s13 }
 0x14a   : > { %p963_p1 = pnand %p967_p11, %p1431_p13 }
 0x14c   : > { %1133 = dma.done.wait (!%p963_p1), %s731_s2, 16  }
 0x14d   : > { %1135 = vsyncadd (!%p963_p1), %s731_s2, 4294967280  ;;  %s20_s21 = sadd.s32 1, %s1166_s21   ;;  %s1432_s14 = smov %s1142_s15 }
 0x14e   : > { %p17_p4 = scmp.ge.s32.totalorder %s20_s21, 6   ;;  %s1433_s15 = smov %s1146_s16 }
 0x14f   : > { %s1434_s16 = smov %s1277_s7  ;;  %s1435_s17 = smov %s1158_s19 }
 0x150   : > { %s1436_s18 = smov %s1162_s20  ;;  %s1437_s19 = smov %s1440_s23 }
 0x151   : > { %s1438_s20 = smov %s1444_s24  ;;  %19 = sbr.rel (!%p17_p4) target bundleno = 9 (0x9), region = 77 }
 0x158   :  { %735 = vsyncpa [#allocation4], 1 }
 0x159   :  { %737 = vsyncpa [#allocation4 + $0x1], 1 }
 0x15a   :  { %738 = vsyncpa [#allocation5], 1 }
 0x15b   :  { %740 = vsyncpa [#allocation5 + $0x1], 1 }

</bundles_post_ra>
